<compile_context>
chip_gen: v7x
topology: tpu7x:2x2x1
jax: 0.10.0
libtpu: 0.0.40
codegen_flags: <defaults>
</compile_context>

<pallas_src>
import jax
import jax.numpy as jnp
from jax.experimental import pallas as pl
from jax.experimental.pallas import tpu as pltpu


def _round_up(x, m):
    return ((x + m - 1) // m) * m


def _choose_tiling(n, c, itemsize):
    """Pick (row_tile, class_tile, vmem_limit_bytes) for this generation."""
    try:
        vmem_cap = int(pltpu.get_tpu_info().vmem_capacity_bytes)
    except Exception:  # pragma: no cover - conservative fallback (v7x per-core)
        vmem_cap = 64 * 1024 * 1024
    budget = int(vmem_cap * 0.7)          # headroom for compiler scratch

    row_align = max(8, 32 // itemsize)    # 8 for f32, 16 for bf16 packing
    c128 = _round_up(c, 128)
    n_cap = _round_up(max(n, row_align), row_align)

    def in_flight(tn, tc):
        # Pallas double-buffers every input/output block.
        return (2 * tn * tc * itemsize    # logits block
                + 2 * tn * (4 + 4)        # gt + mask blocks
                + 3 * tn * 4              # m/s/t VMEM scratch
                + 2 * tn * 4)             # per-row loss output block

    tn = 0
    for cand in (1024, 512, 256, 128, 64, 32, 16, 8):
        t = min(_round_up(cand, row_align), n_cap)
        if in_flight(t, c128) <= budget:
            tn = t
            break

    if tn >= min(64, n_cap):
        tc = c128                          # whole class axis in one block
    else:
        # Huge vocab: keep rows wide, stream logsumexp over the class axis.
        tn = min(_round_up(256, row_align), n_cap)
        tc = (budget - 2 * tn * 8 - 5 * tn * 4) // (2 * tn * itemsize)
        tc = min(max(128, (tc // 128) * 128), c128)

    vmem_limit = int(min(vmem_cap, max(in_flight(tn, tc) + (4 << 20), 32 << 20)))
    return tn, tc, vmem_limit


def _ce_loss_kernel(pred_ref, gt_ref, mask_ref, out_ref, m_sc, s_sc, t_sc):
    """Streaming cross-entropy over class blocks; per-row losses out."""
    j = pl.program_id(1)
    nc = pl.num_programs(1)

    @pl.when(j == 0)
    def _():
        m_sc[...] = jnp.full_like(m_sc, -jnp.inf)
        s_sc[...] = jnp.zeros_like(s_sc)
        t_sc[...] = jnp.zeros_like(t_sc)

    x = pred_ref[...].astype(jnp.float32)            # (tn, tc) logits
    gt = gt_ref[...]                                 # (tn, 1) int32 targets
    tc = x.shape[1]

    # One-hot select of the target logit (global class index); each target
    # falls in exactly one class block, so accumulation across blocks is exact.
    col = jax.lax.broadcasted_iota(jnp.int32, x.shape, 1) + j * tc
    t_sc[...] += jnp.sum(jnp.where(col == gt, x, 0.0), axis=-1, keepdims=True)

    # Online (streaming) logsumexp across the class axis.
    blk_max = jnp.max(x, axis=-1, keepdims=True)
    m_new = jnp.maximum(m_sc[...], blk_max)
    alpha = jnp.exp(m_sc[...] - m_new)               # exp(-inf) == 0 at init
    s_sc[...] = alpha * s_sc[...] + jnp.sum(jnp.exp(x - m_new),
                                            axis=-1, keepdims=True)
    m_sc[...] = m_new

    @pl.when(j == nc - 1)
    def _():
        lse = jnp.log(s_sc[...]) + m_sc[...]                     # (tn, 1)
        per_tok = (lse - t_sc[...]) * mask_ref[...].astype(jnp.float32)
        out_ref[...] = per_tok


def gpt_loss(pred, gt, mask=None, *, tile_rows=None, tile_cols=None):
    """pred: (B, T, C) float; gt: (B, T) int; mask: (B, T) float or None."""
    B, T, C = pred.shape
    N = B * T
    itemsize = jnp.dtype(pred.dtype).itemsize

    tn, tc, vmem_limit = _choose_tiling(N, C, itemsize)
    if tile_rows is not None:
        tn = _round_up(tile_rows, 8)
    if tile_cols is not None:
        tc = _round_up(tile_cols, 128)
    n_pad = _round_up(N, tn)
    c_pad = _round_up(C, tc)

    pred_2d = pred.reshape(N, C)
    gt_2d = gt.astype(jnp.int32).reshape(N, 1)
    if mask is None:
        mask_2d = jnp.ones((N, 1), dtype=jnp.float32)
    else:
        mask_2d = mask.astype(jnp.float32).reshape(N, 1)

    # Pad the class axis to a lane-dense multiple of the class tile with a
    # very negative (finite) value so it never affects max / sumexp / argmax.
    if c_pad != C:
        neg = float(jnp.finfo(pred_2d.dtype).min)
        pred_2d = jnp.pad(pred_2d, ((0, 0), (0, c_pad - C)), constant_values=neg)
    # Pad rows so the grid covers N; padded rows get mask 0 -> contribute 0.
    if n_pad != N:
        pred_2d = jnp.pad(pred_2d, ((0, n_pad - N), (0, 0)))
        gt_2d = jnp.pad(gt_2d, ((0, n_pad - N), (0, 0)))
        mask_2d = jnp.pad(mask_2d, ((0, n_pad - N), (0, 0)))

    grid = (n_pad // tn, c_pad // tc)

    per_row = pl.pallas_call(
        _ce_loss_kernel,
        out_shape=jax.ShapeDtypeStruct((n_pad, 1), jnp.float32),
        grid_spec=pltpu.PrefetchScalarGridSpec(
            num_scalar_prefetch=0,
            grid=grid,
            in_specs=[
                pl.BlockSpec((tn, tc), lambda i, j: (i, j)),   # logits tile
                pl.BlockSpec((tn, 1), lambda i, j: (i, 0)),    # targets tile
                pl.BlockSpec((tn, 1), lambda i, j: (i, 0)),    # mask tile
            ],
            out_specs=pl.BlockSpec((tn, 1), lambda i, j: (i, 0)),
            scratch_shapes=[
                pltpu.VMEM((tn, 1), jnp.float32),   # running max
                pltpu.VMEM((tn, 1), jnp.float32),   # running sum(exp)
                pltpu.VMEM((tn, 1), jnp.float32),   # accumulated target logit
            ],
        ),
        compiler_params=pltpu.CompilerParams(
            dimension_semantics=("parallel", "arbitrary"),
            vmem_limit_bytes=vmem_limit,
        ),
    )(pred_2d, gt_2d, mask_2d)

    # torch's loss.mean() divides by B*T regardless of mask.
    return jnp.sum(per_row) / jnp.float32(N)


def _reference_loss(pred, gt, mask=None):
    # Plain-JAX reference of the PyTorch forward, for a sanity check.
    logp = jax.nn.log_softmax(pred.astype(jnp.float32), axis=-1)
    nll = -jnp.take_along_axis(logp, gt[..., None].astype(jnp.int32),
                               axis=-1)[..., 0]
    if mask is not None:
        nll = nll * mask.astype(jnp.float32)
    return jnp.mean(nll)


if __name__ == "__main__":
    B, T, C = 2, 8, 32  # batch, seq, num classes
    key = jax.random.PRNGKey(0)
    k1, k2, k3 = jax.random.split(key, 3)

    pred = jax.random.normal(k1, (B, T, C), dtype=jnp.float32)
    gt = jax.random.randint(k2, (B, T), 0, C, dtype=jnp.int32)
    mask = (jax.random.uniform(k3, (B, T)) > 0.3).astype(jnp.float32)

    # masked case (single class block, padded C)
    loss_masked = jax.block_until_ready(gpt_loss(pred, gt, mask))
    ref_masked = _reference_loss(pred, gt, mask)
    assert jnp.allclose(loss_masked, ref_masked, atol=1e-5, rtol=1e-5), (
        loss_masked, ref_masked)

    # unmasked case
    loss_plain = jax.block_until_ready(gpt_loss(pred, gt, None))
    ref_plain = _reference_loss(pred, gt, None)
    assert jnp.allclose(loss_plain, ref_plain, atol=1e-5, rtol=1e-5), (
        loss_plain, ref_plain)

    # bf16 logits path (halves the dominant HBM read traffic)
    pred_bf16 = pred.astype(jnp.bfloat16)
    loss_bf16 = jax.block_until_ready(gpt_loss(pred_bf16, gt, mask))
    ref_bf16 = _reference_loss(pred_bf16, gt, mask)
    assert jnp.allclose(loss_bf16, ref_bf16, atol=1e-4, rtol=1e-4), (
        loss_bf16, ref_bf16)

    # streaming-logsumexp path: ragged N and C forcing multiple row/class blocks
    B2, T2, C2 = 3, 5, 300
    k4, k5, k6 = jax.random.split(jax.random.PRNGKey(1), 3)
    pred2 = jax.random.normal(k4, (B2, T2, C2), dtype=jnp.float32)
    gt2 = jax.random.randint(k5, (B2, T2), 0, C2, dtype=jnp.int32)
    mask2 = (jax.random.uniform(k6, (B2, T2)) > 0.3).astype(jnp.float32)
    loss_stream = jax.block_until_ready(
        gpt_loss(pred2, gt2, mask2, tile_rows=8, tile_cols=128))
    ref_stream = _reference_loss(pred2, gt2, mask2)
    assert jnp.allclose(loss_stream, ref_stream, atol=1e-5, rtol=1e-5), (
        loss_stream, ref_stream)

    print("KERNEL_OK")
</pallas_src>

<mosaic_0001>
module attributes {stable_mosaic.version = 11 : i64} {
  func.func @_ce_loss_kernel(%arg0: i32, %arg1: i32, %arg2: memref<16x128xf32, #tpu.memory_space<vmem>>, %arg3: memref<16x1xi32, #tpu.memory_space<vmem>>, %arg4: memref<16x1xf32, #tpu.memory_space<vmem>>, %arg5: memref<16x1xf32, #tpu.memory_space<vmem>>, %arg6: memref<16x1xf32, #tpu.memory_space<vmem>>, %arg7: memref<16x1xf32, #tpu.memory_space<vmem>>, %arg8: memref<16x1xf32, #tpu.memory_space<vmem>>) attributes {dimension_semantics = [#tpu.dimension_semantics<parallel>, #tpu.dimension_semantics<arbitrary>], iteration_bounds = array<i64: 1, 1>, scalar_prefetch = 0 : i64, scratch_operands = 3 : i64, tpu.core_type = #tpu.core_type<tc>, window_params = [{transform_indices = @transform_0, window_bounds = array<i64: 16, 128>}, {transform_indices = @transform_1, window_bounds = array<i64: 16, 1>}, {transform_indices = @transform_2, window_bounds = array<i64: 16, 1>}, {transform_indices = @transform_3, window_bounds = array<i64: 16, 1>}]} {
    %c0_i32 = arith.constant 0 : i32
    %0 = arith.cmpi eq, %arg1, %c0_i32 : i32
    %1 = arith.extui %0 : i1 to i32
    %c0_i32_0 = arith.constant 0 : i32
    %2 = arith.cmpi ne, %1, %c0_i32_0 : i32
    scf.if %2 {
      %cst_23 = arith.constant 0xFF800000 : f32
      %38 = vector.broadcast %cst_23 : f32 to vector<16x1xf32>
      %c0_24 = arith.constant 0 : index
      %c0_25 = arith.constant 0 : index
      %39 = vector.load %arg6[%c0_24, %c0_25] : memref<16x1xf32, #tpu.memory_space<vmem>>, vector<16x1xf32>
      tpu.vector_store %arg6[%c0_24, %c0_25], %38 {strides = array<i32>} : memref<16x1xf32, #tpu.memory_space<vmem>>, vector<16x1xf32>,
      %cst_26 = arith.constant 0.000000e+00 : f32
      %40 = vector.broadcast %cst_26 : f32 to vector<16x1xf32>
      %c0_27 = arith.constant 0 : index
      %c0_28 = arith.constant 0 : index
      %41 = vector.load %arg7[%c0_27, %c0_28] : memref<16x1xf32, #tpu.memory_space<vmem>>, vector<16x1xf32>
      tpu.vector_store %arg7[%c0_27, %c0_28], %40 {strides = array<i32>} : memref<16x1xf32, #tpu.memory_space<vmem>>, vector<16x1xf32>,
      %cst_29 = arith.constant 0.000000e+00 : f32
      %42 = vector.broadcast %cst_29 : f32 to vector<16x1xf32>
      %c0_30 = arith.constant 0 : index
      %c0_31 = arith.constant 0 : index
      %43 = vector.load %arg8[%c0_30, %c0_31] : memref<16x1xf32, #tpu.memory_space<vmem>>, vector<16x1xf32>
      tpu.vector_store %arg8[%c0_30, %c0_31], %42 {strides = array<i32>} : memref<16x1xf32, #tpu.memory_space<vmem>>, vector<16x1xf32>,
    } else {
    }
    %c0 = arith.constant 0 : index
    %c0_1 = arith.constant 0 : index
    %3 = vector.load %arg2[%c0, %c0_1] : memref<16x128xf32, #tpu.memory_space<vmem>>, vector<16x128xf32>
    %c0_2 = arith.constant 0 : index
    %c0_3 = arith.constant 0 : index
    %4 = vector.load %arg3[%c0_2, %c0_3] : memref<16x1xi32, #tpu.memory_space<vmem>>, vector<16x1xi32>
    %5 = tpu.iota {dimensions = array<i32: 1>} : vector<16x128xi32>
    %c128_i32 = arith.constant 128 : i32
    %6 = arith.muli %arg1, %c128_i32 : i32
    %7 = vector.broadcast %6 : i32 to vector<16x128xi32>
    %8 = arith.addi %5, %7 : vector<16x128xi32>
    %c0_4 = arith.constant 0 : index
    %c0_5 = arith.constant 0 : index
    %9 = vector.load %arg8[%c0_4, %c0_5] : memref<16x1xf32, #tpu.memory_space<vmem>>, vector<16x1xf32>
    %10 = vector.broadcast %4 : vector<16x1xi32> to vector<16x128xi32>
    %11 = arith.cmpi eq, %8, %10 : vector<16x128xi32>
    %cst = arith.constant 0.000000e+00 : f32
    %12 = vector.broadcast %cst : f32 to vector<16x128xf32>
    %13 = arith.select %11, %3, %12 : vector<16x128xi1>, vector<16x128xf32>
    %cst_6 = arith.constant dense<0.000000e+00> : vector<16xf32>
    %14 = vector.multi_reduction <add>, %13, %cst_6 [1] : vector<16x128xf32> to vector<16xf32>
    %15 = vector.shape_cast %14 : vector<16xf32> to vector<16x1xf32>
    %16 = arith.addf %9, %15 : vector<16x1xf32>
    %c0_7 = arith.constant 0 : index
    %c0_8 = arith.constant 0 : index
    %17 = vector.load %arg8[%c0_7, %c0_8] : memref<16x1xf32, #tpu.memory_space<vmem>>, vector<16x1xf32>
    tpu.vector_store %arg8[%c0_7, %c0_8], %16 {strides = array<i32>} : memref<16x1xf32, #tpu.memory_space<vmem>>, vector<16x1xf32>,
    %cst_9 = arith.constant dense<0xFF800000> : vector<16xf32>
    %18 = vector.multi_reduction <maximumf>, %3, %cst_9 [1] : vector<16x128xf32> to vector<16xf32>
    %19 = vector.shape_cast %18 : vector<16xf32> to vector<16x1xf32>
    %c0_10 = arith.constant 0 : index
    %c0_11 = arith.constant 0 : index
    %20 = vector.load %arg6[%c0_10, %c0_11] : memref<16x1xf32, #tpu.memory_space<vmem>>, vector<16x1xf32>
    %21 = arith.maximumf %20, %19 : vector<16x1xf32>
    %c0_12 = arith.constant 0 : index
    %c0_13 = arith.constant 0 : index
    %22 = vector.load %arg6[%c0_12, %c0_13] : memref<16x1xf32, #tpu.memory_space<vmem>>, vector<16x1xf32>
    %23 = arith.subf %22, %21 : vector<16x1xf32>
    %24 = math.exp %23 : vector<16x1xf32>
    %c0_14 = arith.constant 0 : index
    %c0_15 = arith.constant 0 : index
    %25 = vector.load %arg7[%c0_14, %c0_15] : memref<16x1xf32, #tpu.memory_space<vmem>>, vector<16x1xf32>
    %26 = arith.mulf %24, %25 : vector<16x1xf32>
    %27 = vector.broadcast %21 : vector<16x1xf32> to vector<16x128xf32>
    %28 = arith.subf %3, %27 : vector<16x128xf32>
    %29 = math.exp %28 : vector<16x128xf32>
    %cst_16 = arith.constant dense<0.000000e+00> : vector<16xf32>
    %30 = vector.multi_reduction <add>, %29, %cst_16 [1] : vector<16x128xf32> to vector<16xf32>
    %31 = vector.shape_cast %30 : vector<16xf32> to vector<16x1xf32>
    %32 = arith.addf %26, %31 : vector<16x1xf32>
    %c0_17 = arith.constant 0 : index
    %c0_18 = arith.constant 0 : index
    %33 = vector.load %arg7[%c0_17, %c0_18] : memref<16x1xf32, #tpu.memory_space<vmem>>, vector<16x1xf32>
    tpu.vector_store %arg7[%c0_17, %c0_18], %32 {strides = array<i32>} : memref<16x1xf32, #tpu.memory_space<vmem>>, vector<16x1xf32>,
    %c0_19 = arith.constant 0 : index
    %c0_20 = arith.constant 0 : index
    %34 = vector.load %arg6[%c0_19, %c0_20] : memref<16x1xf32, #tpu.memory_space<vmem>>, vector<16x1xf32>
    tpu.vector_store %arg6[%c0_19, %c0_20], %21 {strides = array<i32>} : memref<16x1xf32, #tpu.memory_space<vmem>>, vector<16x1xf32>,
    %c0_i32_21 = arith.constant 0 : i32
    %35 = arith.cmpi eq, %arg1, %c0_i32_21 : i32
    %36 = arith.extui %35 : i1 to i32
    %c0_i32_22 = arith.constant 0 : i32
    %37 = arith.cmpi ne, %36, %c0_i32_22 : i32
    scf.if %37 {
      %c0_23 = arith.constant 0 : index
      %c0_24 = arith.constant 0 : index
      %38 = vector.load %arg7[%c0_23, %c0_24] : memref<16x1xf32, #tpu.memory_space<vmem>>, vector<16x1xf32>
      %39 = math.log %38 : vector<16x1xf32>
      %c0_25 = arith.constant 0 : index
      %c0_26 = arith.constant 0 : index
      %40 = vector.load %arg6[%c0_25, %c0_26] : memref<16x1xf32, #tpu.memory_space<vmem>>, vector<16x1xf32>
      %41 = arith.addf %39, %40 : vector<16x1xf32>
      %c0_27 = arith.constant 0 : index
      %c0_28 = arith.constant 0 : index
      %42 = vector.load %arg8[%c0_27, %c0_28] : memref<16x1xf32, #tpu.memory_space<vmem>>, vector<16x1xf32>
      %43 = arith.subf %41, %42 : vector<16x1xf32>
      %c0_29 = arith.constant 0 : index
      %c0_30 = arith.constant 0 : index
      %44 = vector.load %arg4[%c0_29, %c0_30] : memref<16x1xf32, #tpu.memory_space<vmem>>, vector<16x1xf32>
      %45 = arith.mulf %43, %44 : vector<16x1xf32>
      %c0_31 = arith.constant 0 : index
      %c0_32 = arith.constant 0 : index
      %46 = vector.load %arg5[%c0_31, %c0_32] : memref<16x1xf32, #tpu.memory_space<vmem>>, vector<16x1xf32>
      tpu.vector_store %arg5[%c0_31, %c0_32], %45 {strides = array<i32>} : memref<16x1xf32, #tpu.memory_space<vmem>>, vector<16x1xf32>,
    } else {
    }
    return
  }
  func.func @transform_0(%arg0: i32, %arg1: i32) -> (i32, i32) {
    %c0_i32 = arith.constant 0 : i32
    return %arg0, %arg1 : i32, i32
  }
  func.func @transform_1(%arg0: i32, %arg1: i32) -> (i32, i32) {
    %c0_i32 = arith.constant 0 : i32
    %c0_i32_0 = arith.constant 0 : i32
    return %arg0, %c0_i32 : i32, i32
  }
  func.func @transform_2(%arg0: i32, %arg1: i32) -> (i32, i32) {
    %c0_i32 = arith.constant 0 : i32
    %c0_i32_0 = arith.constant 0 : i32
    return %arg0, %c0_i32 : i32, i32
  }
  func.func @transform_3(%arg0: i32, %arg1: i32) -> (i32, i32) {
    %c0_i32 = arith.constant 0 : i32
    %c0_i32_0 = arith.constant 0 : i32
    return %arg0, %c0_i32 : i32, i32
  }
}

</mosaic_0001>

<bundles_post_ra>
// kernel: tpu_custom_call.1
= control target key start
LH: loop header
LB: loop body
LE: loop exit
PB: predicated region body
PF: predicated region fallthrough
CT: control target
= control target key end

     0   :  { %vm18_vm0 = vcmask 7168   ;;  %v143_v1 = vmov -inf   ;;  %v144_v3 = vmov 0   ;;  %v145_v4 = vmov 0.0   ;;  %s204_s0 = inlined_call_operand.vmem [shape: f32[16,128], index: 0, kind: input, shape index: {}]   ;;  %s205_s1 = inlined_call_operand.vmem [shape: s32[16,1], index: 1, kind: input, shape index: {}]   ;;  %s206_s2 = inlined_call_operand.vmem [shape: f32[16,1], index: 2, kind: input, shape index: {}]   ;;  %s207_s3 = inlined_call_operand.vmem [shape: f32[16,1], index: 3, kind: output, shape index: {}]  }
   0x1   :  { %v25_v0 = vld [vmem:[%s204_s0] sm:$0xff]  ;;  %19 = vst.msk [vmem:[#allocation2] sm:$0xff] %vm18_vm0, %v143_v1  ;;  %20 = vst.msk [vmem:[#allocation2 + $0x8] sm:$0xff] %vm18_vm0, %v143_v1  ;;  %v26_v2 = vld [vmem:[%s204_s0 + $0x8] sm:$0xff]  ;;  %129 = vset.pattern.permute.xlu1 %v144_v3  ;;  %130 = vset.pattern.permute.xlu0 %v144_v3  ;;  %v29_v15 = vlaneseq }
   0x2   :  { %55 = vmax.xlane.f32.xlu0 %v25_v0  ;;  %21 = vst.msk [vmem:[#allocation3] sm:$0xff] %vm18_vm0, %v145_v4  ;;  %22 = vst.msk [vmem:[#allocation3 + $0x8] sm:$0xff] %vm18_vm0, %v145_v4  ;;  %v27_v5 = vld [vmem:[%s205_s1] sm:$0xff]  ;;  %v28_v14 = vld [vmem:[%s205_s1 + $0x8] sm:$0xff] }
   0x3   :  { %23 = vst.msk [vmem:[#allocation4] sm:$0xff] %vm18_vm0, %v145_v4  ;;  %24 = vst.msk [vmem:[#allocation4 + $0x8] sm:$0xff] %vm18_vm0, %v145_v4  ;;  %v30_v16 = vand.u32 127, %v29_v15  ;;  %v116_v55 = vld [vmem:[%s206_s2] sm:$0xff]  ;;  %v117_v61 = vld [vmem:[%s206_s2 + $0x8] sm:$0xff] }
   0x6   :  { %57 = vmax.xlane.f32.xlu0 %v26_v2 }
   0x8   :  { %v59_v6 = vld [vmem:[#allocation2] sm:$0xff]  ;;  %v60_v9 = vld [vmem:[#allocation2 + $0x8] sm:$0xff] }
   0x9   :  { %v69_v35 = vld [vmem:[#allocation3] sm:$0xff]  ;;  %v70_v39 = vld [vmem:[#allocation3 + $0x8] sm:$0xff] }
   0xa   :  { %v34_v29 = vld [vmem:[#allocation4] sm:$0xff]  ;;  %v35_v44 = vld [vmem:[#allocation4 + $0x8] sm:$0xff] }
  0x1c   :  { %37 = vperm.xlu0 %130, %v27_v5  }
  0x8f   :  { %v56_v7 = vpop.xlane.xlu0 %55 }
  0x90   :  { %v61_v8 = vmax.f32 %v59_v6, %v56_v7 }
  0x92   :  { %v63_v10 = vsub.f32 %v59_v6, %v61_v8  ;;  %97 = vst.msk [vmem:[#allocation2] sm:$0xff] %vm18_vm0, %v61_v8  ;;  %75 = vperm.xlu1 %129, %v61_v8  }
  0x93   :  { %v58_v11 = vpop.xlane.xlu0 %57 }
  0x94   :  { %v62_v12 = vmax.f32 %v60_v9, %v58_v11  ;;  %v65_v32 = vmul.f32 1.442695, %v63_v10 }
  0x96   :  { %v64_v13 = vsub.f32 %v60_v9, %v62_v12  ;;  %98 = vst.msk [vmem:[#allocation2 + $0x8] sm:$0xff] %vm18_vm0, %v62_v12  ;;  %80 = vperm.xlu1 %129, %v62_v12  }
  0x98   :  { %v67_v33 = vmul.f32 1.442695, %v64_v13 }
  0x99   :  { %v108_v51 = vld [vmem:[#allocation2] sm:$0xff] }
  0x9a   :  { %40 = vperm.xlu1 %129, %v28_v14  }
  0x9b   :  { %v38_v17 = vpop.permute.xlu0 %37 }
  0x9c   :  { %vm42_vm1 = vcmp.eq.s32.totalorder %v30_v16, %v38_v17 }
  0x9d   :  { %v44_v18 = vsel %vm42_vm1, %v25_v0, 0.0  ;;  %v109_v58 = vld [vmem:[#allocation2 + $0x8] sm:$0xff] }
  0x9e   :  { %46 = vadd.xlane.f32.xlu0 %v44_v18 }
 0x111   :  { %v76_v19 = vpop.permute.xlu1 %75 }
 0x112   :  { %v83_v20 = vsub.f32 %v25_v0, %v76_v19 }
 0x114   :  { %v85_v21 = vmul.f32 1.442695, %v83_v20 }
 0x115   :  { %v81_v22 = vpop.permute.xlu1 %80 }
 0x116   :  { %131 = vpow2.f32 %v85_v21  ;;  %v84_v23 = vsub.f32 %v26_v2, %v81_v22 }
 0x118   :  { %v87_v24 = vmul.f32 1.442695, %v84_v23 }
 0x119   :  { %v41_v26 = vpop.permute.xlu1 %40 }
 0x11a   :  { %133 = vpow2.f32 %v87_v24  ;;  %vm43_vm2 = vcmp.eq.s32.totalorder %v30_v16, %v41_v26 }
 0x11b   :  { %v45_v28 = vsel %vm43_vm2, %v26_v2, 0.0  ;;  %135 = vpow2.f32 %v65_v32 }
 0x11c   :  { %137 = vpow2.f32 %v67_v33 }
 0x120   :  { %v132_v25 = vpop.eup %131 }
 0x121   :  { %89 = vadd.xlane.f32.xlu1 %v132_v25 }
 0x124   :  { %v134_v27 = vpop.eup %133 }
 0x125   :  { %91 = vadd.xlane.f32.xlu1 %v134_v27  ;;  %v136_v34 = vpop.eup %135 }
 0x126   :  { %v71_v36 = vmul.f32 %v136_v34, %v69_v35  ;;  %v138_v37 = vpop.eup %137 }
 0x127   :  { %v72_v41 = vmul.f32 %v138_v37, %v70_v39 }
 0x129   :  { %48 = vadd.xlane.f32.xlu1 %v45_v28 }
 0x12b   :  { %v47_v30 = vpop.xlane.xlu0 %46 }
 0x12c   :  { %v50_v31 = vadd.f32 %v47_v30, %v34_v29 }
 0x12e   :  { %53 = vst.msk [vmem:[#allocation4] sm:$0xff] %vm18_vm0, %v50_v31 }
 0x135   :  { %v112_v52 = vld [vmem:[#allocation4] sm:$0xff] }
 0x1ae   :  { %v90_v38 = vpop.xlane.xlu1 %89 }
 0x1af   :  { %v93_v40 = vadd.f32 %v90_v38, %v71_v36 }
 0x1b1   :  { %95 = vst.msk [vmem:[#allocation3] sm:$0xff] %vm18_vm0, %v93_v40 }
 0x1b2   :  { %v92_v42 = vpop.xlane.xlu1 %91 }
 0x1b3   :  { %v94_v43 = vadd.f32 %v92_v42, %v72_v41 }
 0x1b5   :  { %96 = vst.msk [vmem:[#allocation3 + $0x8] sm:$0xff] %vm18_vm0, %v94_v43 }
 0x1b6   :  { %v49_v45 = vpop.xlane.xlu1 %48 }
 0x1b7   :  { %v51_v46 = vadd.f32 %v49_v45, %v35_v44 }
 0x1b8   :  { %v102_v47 = vld [vmem:[#allocation3] sm:$0xff] }
 0x1b9   :  { %139 = vlog2.f32 %v102_v47  ;;  %54 = vst.msk [vmem:[#allocation4 + $0x8] sm:$0xff] %vm18_vm0, %v51_v46 }
 0x1bc   :  { %v103_v48 = vld [vmem:[#allocation3 + $0x8] sm:$0xff] }
 0x1bd   :  { %141 = vlog2.f32 %v103_v48 }
 0x1c0   :  { %v113_v62 = vld [vmem:[#allocation4 + $0x8] sm:$0xff] }
 0x1c3   :  { %v140_v49 = vpop.eup %139 }
 0x1c4   :  { %v105_v50 = vmul.f32 0.6931472, %v140_v49 }
 0x1c6   :  { %v110_v53 = vadd.f32 %v108_v51, %v105_v50 }
 0x1c7   :  { %v142_v54 = vpop.eup %141 }
 0x1c8   :  { %v107_v56 = vmul.f32 0.6931472, %v142_v54  ;;  %v114_v57 = vsub.f32 %v110_v53, %v112_v52 }
 0x1ca   :  { %v111_v59 = vadd.f32 %v109_v58, %v107_v56  ;;  %v118_v60 = vmul.f32 %v116_v55, %v114_v57 }
 0x1cc   :  { %v115_v63 = vsub.f32 %v111_v59, %v113_v62  ;;  %120 = vst.msk [vmem:[%s207_s3] sm:$0xff] %vm18_vm0, %v118_v60 }
 0x1ce   :  { %v119_v0 = vmul.f32 %v117_v61, %v115_v63 }
 0x1d0   :  { %121 = vst.msk [vmem:[%s207_s3 + $0x8] sm:$0xff] %vm18_vm0, %v119_v0 }

</bundles_post_ra>
